<compile_context>
chip_gen: v7x
topology: tpu7x:2x2x1
jax: 0.10.0
libtpu: 0.0.40
codegen_flags: <defaults>
</compile_context>

<pallas_src>
import functools

import jax
import jax.numpy as jnp
from jax.experimental import pallas as pl
from jax.experimental.pallas import tpu as pltpu


def _round_up(x: int, m: int) -> int:
    return ((x + m - 1) // m) * m


def _sparse_dense_kernel(x_ref, w_ref, b_ref, o_ref, *, compute_dtype):
    # x_ref: (tm, tk) [x dtype], w_ref: (tk, tn) [compute dtype], b_ref: (1, tn) f32,
    # o_ref: (tm, tn) f32 (resident across the k axis -> used as the accumulator).
    k = pl.program_id(2)

    @pl.when(k == 0)
    def _():
        # Initialise the resident output tile with the (sublane-broadcast) bias.
        o_ref[...] = jnp.zeros_like(o_ref) + b_ref[...].astype(o_ref.dtype)

    # bf16 MXU operands, f32 accumulation. Casting the activation tile in-kernel avoids
    # an extra HBM pass over x; the weight is already stored in compute_dtype.
    o_ref[...] += jnp.dot(
        x_ref[...].astype(compute_dtype),
        w_ref[...].astype(compute_dtype),
        preferred_element_type=jnp.float32,
    )


@functools.partial(
    jax.jit, static_argnames=("tm", "tn", "tk", "use_bf16", "force_pallas")
)
def sparse_dense_forward(
    x, weight, bias, *, tm=512, tn=512, tk=1024, use_bf16=True, force_pallas=False
):
    """y = x @ weight + bias, matching SparseDense.forward (dense linear)."""
    in_features, out_features = weight.shape
    orig_shape = x.shape
    assert orig_shape[-1] == in_features

    # Flatten leading dims -> (M, K)
    x2d = x.reshape(-1, in_features)
    M, K = x2d.shape
    N = out_features

    # ---- Small-problem fast path: padding + pallas_call overhead dominates. ----
    if not force_pallas and 2 * M * K * N < (1 << 22):
        out = jnp.dot(x2d, weight, preferred_element_type=jnp.float32) + bias
        return out.astype(x.dtype).reshape(*orig_shape[:-1], out_features)

    compute_dtype = jnp.bfloat16 if use_bf16 else x2d.dtype

    # ---- Tile-size selection. ----
    # x tile stays in its own dtype (f32) in VMEM, so sublane multiple of 8 is enough.
    tm_eff = min(tm, _round_up(M, 8))
    tn_eff = min(tn, _round_up(N, 128))

    # K must be zero-padded for reduction correctness. Pick tk_eff so the padding
    # is minimal for the target number of k steps.
    kp128 = _round_up(K, 128)
    nk = max(1, pl.cdiv(kp128, tk))
    tk_eff = _round_up(pl.cdiv(kp128, nk), 128)
    Kp = tk_eff * nk

    grid_m = pl.cdiv(M, tm_eff)
    grid_n = pl.cdiv(N, tn_eff)
    # v7x megacore: guarantee >=2 blocks on the parallel axes so both TCs get work.
    if grid_m * grid_n == 1 and M >= 16:
        tm_eff = _round_up(pl.cdiv(M, 2), 8)
        grid_m = pl.cdiv(M, tm_eff)

    grid = (grid_m, grid_n, nk)

    # ---- Operand preparation (only K gets zero-padded; M/N rely on partial blocks). ----
    if Kp != K:
        x2d = jnp.pad(x2d, ((0, 0), (0, Kp - K)))
    w_p = weight if weight.dtype == compute_dtype else weight.astype(compute_dtype)
    if Kp != K:
        w_p = jnp.pad(w_p, ((0, Kp - K), (0, 0)))
    b2d = bias.astype(jnp.float32).reshape(1, N)

    # ---- Advisory cost estimate (counts operand re-reads across the 3-axis grid). ----
    x_bytes = M * Kp * x2d.dtype.itemsize
    w_bytes = Kp * N * w_p.dtype.itemsize
    cost = pl.CostEstimate(
        flops=2 * M * Kp * N + M * N,
        transcendentals=0,
        bytes_accessed=x_bytes * grid_n + w_bytes * grid_m + M * N * 4 + N * 4 * grid_m,
    )

    # ---- VMEM budget: double-buffered inputs/output + bias (no acc scratch). ----
    vmem_need = 2 * (
        tm_eff * tk_eff * x2d.dtype.itemsize
        + tk_eff * tn_eff * w_p.dtype.itemsize
        + tm_eff * tn_eff * 4
        + tn_eff * 4
    )
    vmem_limit = int(min(max(vmem_need + (4 << 20), 32 << 20), 64 << 20))

    out = pl.pallas_call(
        functools.partial(_sparse_dense_kernel, compute_dtype=compute_dtype),
        out_shape=jax.ShapeDtypeStruct((M, N), jnp.float32),
        grid_spec=pltpu.PrefetchScalarGridSpec(
            num_scalar_prefetch=0,
            grid=grid,
            in_specs=[
                pl.BlockSpec((tm_eff, tk_eff), lambda i, j, k: (i, k)),
                pl.BlockSpec((tk_eff, tn_eff), lambda i, j, k: (k, j)),
                pl.BlockSpec((1, tn_eff), lambda i, j, k: (0, j)),
            ],
            out_specs=pl.BlockSpec((tm_eff, tn_eff), lambda i, j, k: (i, j)),
        ),
        compiler_params=pltpu.CompilerParams(
            dimension_semantics=("parallel", "parallel", "arbitrary"),
            vmem_limit_bytes=vmem_limit,
        ),
        cost_estimate=cost,
    )(x2d, w_p, b2d)

    if out.dtype != x.dtype:
        out = out.astype(x.dtype)
    return out.reshape(*orig_shape[:-1], out_features)


if __name__ == "__main__":
    key = jax.random.PRNGKey(0)
    k_x, k_w = jax.random.split(key)

    batch, in_features, out_features = 2, 32, 64

    # Deterministic parameter init mirroring the PyTorch module:
    #   weight = randn(in_features, out_features) * 0.01 ; bias = zeros(out_features)
    weight = jax.random.normal(k_w, (in_features, out_features), dtype=jnp.float32) * 0.01
    bias = jnp.zeros((out_features,), dtype=jnp.float32)
    x = jax.random.normal(k_x, (batch, in_features), dtype=jnp.float32)

    y_ref = x @ weight + bias

    # Force the Pallas path so the kernel itself is exercised even at this tiny size.
    y = sparse_dense_forward(x, weight, bias, force_pallas=True)
    jax.block_until_ready(y)
    assert y.shape == (batch, out_features)
    assert jnp.allclose(y, y_ref, atol=5e-3, rtol=5e-2)

    # Default call at this size takes the jnp fast path (f32) -> must match tightly.
    y_fast = sparse_dense_forward(x, weight, bias)
    jax.block_until_ready(y_fast)
    assert jnp.allclose(y_fast, y_ref, atol=1e-5, rtol=1e-5)

    # Larger multi-tile shape: exercises bf16 MXU path, K zero-padding, partial M/N
    # boundary blocks and the 3-axis grid.
    kb_x, kb_w = jax.random.split(jax.random.PRNGKey(1))
    xb = jax.random.normal(kb_x, (3, 300, 520), dtype=jnp.float32)
    wb = jax.random.normal(kb_w, (520, 650), dtype=jnp.float32) * 0.01
    bb = 0.1 * jnp.ones((650,), dtype=jnp.float32)

    yb = sparse_dense_forward(xb, wb, bb)
    jax.block_until_ready(yb)
    assert yb.shape == (3, 300, 650)

    # Reference with the same bf16 operand rounding (tight check) ...
    yb_bf16_ref = (
        jnp.dot(
            xb.astype(jnp.bfloat16),
            wb.astype(jnp.bfloat16),
            preferred_element_type=jnp.float32,
        )
        + bb
    )
    assert jnp.allclose(yb, yb_bf16_ref, atol=1e-4, rtol=1e-3)
    # ... and a loose sanity check against the exact f32 reference.
    yb_ref = xb @ wb + bb
    assert jnp.allclose(yb, yb_ref, atol=2e-2, rtol=5e-2)

    print("KERNEL_OK")
</pallas_src>

<mosaic_0001>
module attributes {stable_mosaic.version = 11 : i64} {
  func.func @_sparse_dense_kernel(%arg0: i32, %arg1: i32, %arg2: i32, %arg3: memref<8x128xf32, #tpu.memory_space<vmem>>, %arg4: memref<128x128xbf16, #tpu.memory_space<vmem>>, %arg5: memref<1x128xf32, #tpu.memory_space<vmem>>, %arg6: memref<8x128xf32, #tpu.memory_space<vmem>>) attributes {dimension_semantics = [#tpu.dimension_semantics<parallel>, #tpu.dimension_semantics<parallel>, #tpu.dimension_semantics<arbitrary>], iteration_bounds = array<i64: 1, 1, 1>, scalar_prefetch = 0 : i64, scratch_operands = 0 : i64, tpu.core_type = #tpu.core_type<tc>, window_params = [{transform_indices = @transform_0, window_bounds = array<i64: 8, 128>}, {transform_indices = @transform_1, window_bounds = array<i64: 128, 128>}, {transform_indices = @transform_2, window_bounds = array<i64: 1, 128>}, {transform_indices = @transform_3, window_bounds = array<i64: 8, 128>}]} {
    %c0_i32 = arith.constant 0 : i32
    %0 = arith.cmpi eq, %arg2, %c0_i32 : i32
    %1 = arith.extui %0 : i1 to i32
    %c0_i32_0 = arith.constant 0 : i32
    %2 = arith.cmpi ne, %1, %c0_i32_0 : i32
    scf.if %2 {
      %cst_8 = arith.constant 0.000000e+00 : f32
      %10 = vector.broadcast %cst_8 : f32 to vector<8x128xf32>
      %c0_9 = arith.constant 0 : index
      %c0_10 = arith.constant 0 : index
      %11 = vector.load %arg5[%c0_9, %c0_10] : memref<1x128xf32, #tpu.memory_space<vmem>>, vector<1x128xf32>
      %12 = vector.broadcast %11 : vector<1x128xf32> to vector<8x128xf32>
      %13 = arith.addf %10, %12 : vector<8x128xf32>
      %c0_11 = arith.constant 0 : index
      %c0_12 = arith.constant 0 : index
      %14 = vector.load %arg6[%c0_11, %c0_12] : memref<8x128xf32, #tpu.memory_space<vmem>>, vector<8x128xf32>
      tpu.vector_store %arg6[%c0_11, %c0_12], %13 {strides = array<i32>} : memref<8x128xf32, #tpu.memory_space<vmem>>, vector<8x128xf32>,
    } else {
    }
    %c0 = arith.constant 0 : index
    %c0_1 = arith.constant 0 : index
    %3 = vector.load %arg6[%c0, %c0_1] : memref<8x128xf32, #tpu.memory_space<vmem>>, vector<8x128xf32>
    %c0_2 = arith.constant 0 : index
    %c0_3 = arith.constant 0 : index
    %4 = vector.load %arg3[%c0_2, %c0_3] : memref<8x128xf32, #tpu.memory_space<vmem>>, vector<8x128xf32>
    %5 = arith.truncf %4 : vector<8x128xf32> to vector<8x128xbf16>
    %c0_4 = arith.constant 0 : index
    %c0_5 = arith.constant 0 : index
    %6 = vector.load %arg4[%c0_4, %c0_5] : memref<128x128xbf16, #tpu.memory_space<vmem>>, vector<128x128xbf16>
    %cst = arith.constant dense<0.000000e+00> : vector<8x128xf32>
    %7 = tpu.matmul %5, %6, %cst {dimension_numbers = #tpu.dot_dimension_numbers<[1], [0], [0], [1], [0, 0, 1, 1], [], []>} : vector<8x128xbf16>, vector<128x128xbf16>, vector<8x128xf32> -> vector<8x128xf32>
    %8 = arith.addf %3, %7 : vector<8x128xf32>
    %c0_6 = arith.constant 0 : index
    %c0_7 = arith.constant 0 : index
    %9 = vector.load %arg6[%c0_6, %c0_7] : memref<8x128xf32, #tpu.memory_space<vmem>>, vector<8x128xf32>
    tpu.vector_store %arg6[%c0_6, %c0_7], %8 {strides = array<i32>} : memref<8x128xf32, #tpu.memory_space<vmem>>, vector<8x128xf32>,
    return
  }
  func.func @transform_0(%arg0: i32, %arg1: i32, %arg2: i32) -> (i32, i32) {
    %c0_i32 = arith.constant 0 : i32
    return %arg0, %arg2 : i32, i32
  }
  func.func @transform_1(%arg0: i32, %arg1: i32, %arg2: i32) -> (i32, i32) {
    %c0_i32 = arith.constant 0 : i32
    return %arg2, %arg1 : i32, i32
  }
  func.func @transform_2(%arg0: i32, %arg1: i32, %arg2: i32) -> (i32, i32) {
    %c0_i32 = arith.constant 0 : i32
    %c0_i32_0 = arith.constant 0 : i32
    return %c0_i32, %arg1 : i32, i32
  }
  func.func @transform_3(%arg0: i32, %arg1: i32, %arg2: i32) -> (i32, i32) {
    %c0_i32 = arith.constant 0 : i32
    return %arg0, %arg1 : i32, i32
  }
}

</mosaic_0001>

<bundles_post_ra>
// kernel: sparse_dense_forward.1
= control target key start
LH: loop header
LB: loop body
LE: loop exit
PB: predicated region body
PF: predicated region fallthrough
CT: control target
= control target key end

     0   :  { %8 = vsyncpa [#allocation3], 0  ;;  %v229_v1 = vmov 0.0   ;;  %vm230_vm0 = vmmov 0   ;;  %s296_s0 = inlined_call_operand.vmem [shape: f32[2,128], index: 0, kind: input, shape index: {}]   ;;  %s297_s1 = inlined_call_operand.vmem [shape: bf16[128,64], index: 1, kind: input, shape index: {}]   ;;  %s298_s2 = inlined_call_operand.vmem [shape: f32[1,64], index: 2, kind: input, shape index: {}]   ;;  %s299_s3 = inlined_call_operand.hbm [shape: f32[2,64], index: 3, kind: output, shape index: {}]  }
   0x1   :  { %v197_v0 = vld [vmem:[%s297_s1] sm:$0xff]   ;;  %172 = vmatprep.subr.bf16.mxu0 %v229_v1  ;;  %v198_v2 = vld [vmem:[%s297_s1 + $0x8] sm:$0xff]   ;;  %188 = vmatprep.mubr.msk.bf16.mxu0 %vm230_vm0, %v229_v1  ;;  %v199_v3 = vld [vmem:[%s297_s1 + $0x10] sm:$0xff]  }
   0x2   :  { %173 = vmatpush3.bf16.msra.mxu0 %v197_v0  ;;  %v200_v4 = vld [vmem:[%s297_s1 + $0x18] sm:$0xff]   ;;  %v201_v5 = vld [vmem:[%s297_s1 + $0x20] sm:$0xff]   ;;  %v202_v6 = vld [vmem:[%s297_s1 + $0x28] sm:$0xff]  }
   0x3   :  { %174 = vmatprep.subr.bf16.mxu0 %v229_v1  ;;  %v203_v7 = vld [vmem:[%s297_s1 + $0x30] sm:$0xff]   ;;  %v204_v8 = vld [vmem:[%s297_s1 + $0x38] sm:$0xff]   ;;  %v30_v9 = vld [vmem:[%s296_s0] sm:$0xff] }
   0x4   :  { %v31_v10 = vpack.c.bf16 %v30_v9, %v30_v9  ;;  %v154_v11 = vld [vmem:[%s298_s2] ss:$0 sm:$0xff] }
   0x6   :  { %175 = vmatpush3.bf16.msra.mxu0 %v198_v2 }
   0x7   :  { %176 = vmatprep.subr.bf16.mxu0 %v229_v1 }
   0xa   :  { %177 = vmatpush3.bf16.msra.mxu0 %v199_v3 }
   0xb   :  { %178 = vmatprep.subr.bf16.mxu0 %v229_v1 }
   0xe   :  { %179 = vmatpush3.bf16.msra.mxu0 %v200_v4 }
   0xf   :  { %180 = vmatprep.subr.bf16.mxu0 %v229_v1 }
  0x12   :  { %181 = vmatpush3.bf16.msra.mxu0 %v201_v5 }
  0x13   :  { %182 = vmatprep.subr.bf16.mxu0 %v229_v1 }
  0x16   :  { %183 = vmatpush3.bf16.msra.mxu0 %v202_v6 }
  0x17   :  { %184 = vmatprep.subr.bf16.mxu0 %v229_v1 }
  0x1a   :  { %185 = vmatpush3.bf16.msra.mxu0 %v203_v7 }
  0x1b   :  { %186 = vmatprep.subr.bf16.mxu0 %v229_v1 }
  0x1e   :  { %187 = vmatpush3.bf16.msra.mxu0 %v204_v8 }
  0x21   :  { %189 = vmatmul.mubr.bf16.vlgmr.msra.gmra.mrb[0].mxu0 %v31_v10 }
  0xf4   :  { %v130_v12 = vpop.f32.mrb[0].mxu0 }
  0xf5   :  { %v136_v13 = vadd.f32 %v154_v11, %v130_v12  ;;  %v190_v14 = vpop.f32.mrb[1].mxu0 }
  0xf6   :  { %v133_v15 = vpop.f32.mrb[2].mxu0 }
  0xf7   :  { %137 = vst [vmem:[#allocation2] sm:$0xff] %v136_v13  ;;  %v191_v16 = vpop.f32.mrb[3].mxu0 }
  0xf8   :  { %142 = vsyncadd [#allocation3], 96  ;;  %s231_s1 = smov [#allocation2]  }
  0xf9   :  { %s143_s5 = sshll.u32 %s231_s1, 4  ;;  %s144_s5 = int_to_ptr.vmem [resolvable:$true] %s143_s5 }
  0xfa   :  { %s205_s6 = scalar_lea.vmem %s144_s5, 32  ;;  %s209_s0 = scalar_lea.vmem %s144_s5, 128 }
  0xfb   :  { %p206_p0 = scmp.ne.s32.totalorder %s144_s5, %s205_s6  ;;  %p210_p1 = scmp.lt.s32.totalorder %s144_s5, %s144_s5 }
  0xfc   :  { %p211_p2 = scmp.lt.s32.totalorder %s209_s0, %s205_s6 }
  0xfe   :  { %p212_p3 = por %p211_p2, %p210_p1 }
 0x100   :  { %p213_p4 = pnand %p212_p3, %p206_p0 }
 0x102   :  { %216 = shalt.err (!%p213_p4)
}
 0x103   :  { %s217_s8 = scalar_lea.hbm %s299_s3, 32 }
 0x104   :  { %p218_p5 = scmp.ne.s32.totalorder %s299_s3, %s217_s8  ;;  %p221_p6 = scmp.lt.u32.totalorder %s217_s8, %s299_s3 }
 0x106   :  { %p223_p7 = pnand %p221_p6, %p218_p5 }
 0x108   :  { %226 = shalt.err (!%p223_p7)
}
 0x109   :  { %s232_s13 = smov 32   ;;  %s233_s14 = smov 2  }
 0x10a   :  { %149 = dma.vmem_to_hbm [thread:$0]  %s144_s5, 32, %s299_s3, [#allocation3], %s232_s13, %s232_s13, %s233_s14  }
 0x10b   :  { %227 = dma.done.wait [#allocation3], 128  }
 0x10c   :  { %228 = vsyncadd [#allocation3], 4294967168 }
 0x10d   :  { %153 = vsyncpa [#allocation3], 1 }

</bundles_post_ra>
